<compile_context>
chip_gen: v7x
topology: tpu7x:2x2x1
jax: 0.10.0
libtpu: 0.0.40
codegen_flags: <defaults>
</compile_context>

<pallas_src>
import functools

import jax
import jax.numpy as jnp
from jax.experimental import pallas as pl
from jax.experimental.pallas import tpu as pltpu


# ----------------------------- pass 1: normalize -----------------------------


def _normalize_kernel(zi_ref, zj_ref, n_ref):
    """L2-normalize a row tile of each view; write the stacked bf16 panel."""

    def _norm(x):
        x = x.astype(jnp.float32)           # inputs arrive in their original dtype
        ss = jnp.sum(x * x, axis=-1, keepdims=True)
        # F.normalize(p=2, eps=1e-12): x / max(||x||, 1e-12) == x * rsqrt(max(ss, 1e-24))
        inv = jax.lax.rsqrt(jnp.maximum(ss, jnp.float32(1e-24)))
        return (x * inv).astype(jnp.bfloat16)

    n_ref[0] = _norm(zi_ref[...])
    n_ref[1] = _norm(zj_ref[...])


# --------------------------- pass 2: loss / accuracy --------------------------


def _simclr_loss_kernel(q_ref, k_ref, kpos_ref, loss_ref, corr_ref, m_sc, l_sc,
                        *, tau, batch, tq, tk):
    kk = pl.program_id(1)
    nk = pl.num_programs(1)
    q0 = pl.program_id(0) * tq                    # global row offset of this tile
    inv_tau = jnp.float32(1.0 / tau)

    @pl.when(kk == 0)
    def _():
        m_sc[...] = jnp.full((tq, 1), -jnp.inf, jnp.float32)
        l_sc[...] = jnp.zeros((tq, 1), jnp.float32)

    # Fold 1/tau into the small (TQ, D) query tile instead of the (TQ, TK) logits.
    q = (q_ref[...].astype(jnp.float32) * inv_tau).astype(jnp.bfloat16)

    # One fused MXU matmul per step: (TQ, TK) f32 logits against this key chunk.
    s = jax.lax.dot_general(q, k_ref[...], (((1,), (1,)), ((), ())),
                            preferred_element_type=jnp.float32)

    row_ids = q0 + jax.lax.broadcasted_iota(jnp.int32, (tq, 1), 0)        # global rows
    col_ids = kk * tk + jax.lax.broadcasted_iota(jnp.int32, (tq, tk), 1)  # global cols

    # In-place self-similarity mask (diagonal of the aa / bb blocks).
    s = jnp.where(col_ids == row_ids, s - jnp.float32(1e9), s)

    # Online (chunked) log-sum-exp over the 2B "classes".
    m_prev = m_sc[...]
    m_new = jnp.maximum(m_prev, jnp.max(s, axis=-1, keepdims=True))
    l_sc[...] = l_sc[...] * jnp.exp(m_prev - m_new) + jnp.sum(
        jnp.exp(s - m_new), axis=-1, keepdims=True)
    m_sc[...] = m_new

    @pl.when(kk == nk - 1)
    def _():
        # Positive (target) logit from the positive key rows: (TQ, D) work
        # instead of a full-width (TQ, 2B) compare + select + lane reduce.
        # Row r's positive is key row (r + B) mod 2B; kpos_ref holds that tile.
        tgt = jnp.sum(q.astype(jnp.float32) * kpos_ref[...].astype(jnp.float32),
                      axis=-1, keepdims=True)
        m_f = m_sc[...]
        loss_ref[...] = m_f + jnp.log(l_sc[...]) - tgt
        # Accuracy over the first B (a-side) rows: positive logit attains the
        # row max of the masked logits.  (Exact ties count as correct; with a
        # separately accumulated tgt this can differ from torch.argmax on
        # near-exact ties -- metric only, negligible.)
        corr_ref[...] = jnp.logical_and(tgt >= m_f, row_ids < batch).astype(jnp.float32)


# ------------------------------ tiling / budgets ------------------------------


def _vmem_budget_bytes():
    try:
        cap = int(pltpu.get_tpu_info().vmem_capacity_bytes)
    except Exception:                       # conservative fallback (v7x-sized VMEM)
        cap = 64 << 20
    # ~48 MiB usable on v7x (64 MiB physical), ~96 MiB on v5e/v6e (128 MiB),
    # leaving headroom for compiler scratch / semaphores.
    return int(cap * 3 // 4)


def _pick_loss_tiles(batch, d, budget, max_key_chunk=None):
    """Pick (row tile TQ, key chunk TK) for the loss pass."""
    two_b = 2 * batch
    # Row tiles must divide B so the positive-key tile is block aligned.
    tq_cands = [t for t in (512, 256, 128, 64, 32, 16, 8) if batch % t == 0]
    if not tq_cands:
        raise ValueError("batch size must be a multiple of 8")
    # Prefer grid depth >= 8 on the "parallel" row axis (keeps both v7x cores
    # busy with a full pipeline) as long as it does not force TQ below 128.
    deep = [t for t in tq_cands if two_b // t >= 8]
    if deep and deep[0] >= 128:
        tq_cands = deep
    # Key chunks: full resident panel first, then progressively halved chunks.
    tk_cands = [two_b]
    min_chunk = 256 if max_key_chunk is None else max(16, min(256, max_key_chunk))
    while tk_cands[-1] % 16 == 0 and tk_cands[-1] // 2 >= min_chunk:
        tk_cands.append(tk_cands[-1] // 2)
    if max_key_chunk is not None:
        tk_cands = [t for t in tk_cands if t <= max_key_chunk] or [tk_cands[-1]]

    def footprint(tq, tk):
        resident = tk == two_b
        key = (1 if resident else 2) * tk * d * 2     # bf16 key chunk buffer(s)
        tiles = 2 * (2 * tq * d * 2)                  # q + positive-key tiles (dbl buf)
        logits = 5 * tq * tk * 4                      # f32 logits + temporaries
        small = 8 * tq * 128 * 4                      # outputs + m/l scratch (lane pad)
        return key + tiles + logits + small

    for tq in tq_cands:
        for tk in tk_cands:
            if footprint(tq, tk) <= budget:
                return tq, tk
    # TODO(synk): pathological shapes (huge D with tiny budget) may still not
    # fit; fall through with the smallest tiles and let the compiler decide.
    return tq_cands[-1], tk_cands[-1]


def _pick_norm_tile(batch, d, budget):
    # Pass 1 is memory bound with a tiny footprint: use big row tiles
    # (decoupled from pass 2's TQ) to amortize per-grid-step overhead.
    for t in (1024, 512, 256, 128, 64, 32, 16, 8):
        if batch % t == 0 and 24 * t * d <= budget // 2:
            return t
    return 8


# --------------------------------- wrapper -----------------------------------


def simclr_loss(z_i, z_j, dist_labels=None, temperature=0.1, *, max_key_chunk=None):
    """Returns dict with 'loss', 'ssl_loss', 'ssl_acc' (scalars)."""
    B, D = z_i.shape
    assert z_j.shape == (B, D)
    if B % 8 != 0:
        raise ValueError("batch size must be a multiple of 8 (TPU sublane)")
    del dist_labels  # world_size == 1, rank == 0  =>  labels == arange(B)

    two_b = 2 * B
    budget = _vmem_budget_bytes()
    tq, tk = _pick_loss_tiles(B, D, budget, max_key_chunk)
    nq, nk = two_b // tq, two_b // tk
    nb = B // tq                     # block offset of the positive key tile

    # ---- pass 1: normalized, stacked bf16 panel N = [q_a; q_b], shape (2B, D).
    # Inputs are fed in their original dtype; the f32 cast is in-register.
    t1 = _pick_norm_tile(B, D, budget)
    n = pl.pallas_call(
        _normalize_kernel,
        out_shape=jax.ShapeDtypeStruct((2, B, D), jnp.bfloat16),
        grid=(B // t1,),
        in_specs=[
            pl.BlockSpec((t1, D), lambda r: (r, 0)),
            pl.BlockSpec((t1, D), lambda r: (r, 0)),
        ],
        out_specs=pl.BlockSpec((2, t1, D), lambda r: (0, r, 0)),
        compiler_params=pltpu.CompilerParams(
            dimension_semantics=("parallel",), vmem_limit_bytes=budget),
    )(z_i, z_j)
    n = n.reshape(two_b, D)          # layout-only reshape (free)

    # ---- pass 2: fused logits / masked softmax / CE / accuracy.
    kernel = functools.partial(
        _simclr_loss_kernel, tau=float(temperature), batch=B, tq=tq, tk=tk)

    q_spec = pl.BlockSpec((tq, D), lambda i, k: (i, 0))
    kpos_spec = pl.BlockSpec((tq, D), lambda i, k: ((i + nb) % nq, 0))
    out_specs = (
        pl.BlockSpec((tq, 1), lambda i, k: (i, 0)),
        pl.BlockSpec((tq, 1), lambda i, k: (i, 0)),
    )

    def run(single_buffer_keys):
        if single_buffer_keys:
            # Resident key panel: constant index_map => one DMA, one buffer.
            k_spec = pl.BlockSpec((tk, D), lambda i, k: (k, 0),
                                  pipeline_mode=pl.Buffered(1))
        else:
            k_spec = pl.BlockSpec((tk, D), lambda i, k: (k, 0))
        return pl.pallas_call(
            kernel,
            out_shape=(
                jax.ShapeDtypeStruct((two_b, 1), jnp.float32),
                jax.ShapeDtypeStruct((two_b, 1), jnp.float32),
            ),
            grid=(nq, nk),
            in_specs=[q_spec, k_spec, kpos_spec],
            out_specs=out_specs,
            scratch_shapes=[pltpu.VMEM((tq, 1), jnp.float32),
                            pltpu.VMEM((tq, 1), jnp.float32)],
            compiler_params=pltpu.CompilerParams(
                dimension_semantics=("parallel", "arbitrary"),
                vmem_limit_bytes=budget),
        )(n, n, n)

    if nk == 1:
        try:
            row_loss, row_correct = run(True)
        except Exception:
            # TODO(synk): pl.Buffered(1) single-buffering unsupported on this
            # JAX version; fall back to the default double-buffered panel.
            row_loss, row_correct = run(False)
    else:
        row_loss, row_correct = run(False)

    # Tiny final reductions (2B rows) kept in the wrapper so the row axis can
    # stay "parallel" (megacore on v7x).
    loss = jnp.sum(row_loss) / jnp.float32(two_b)    # = (mean_a + mean_b) / 2
    acc = jnp.float32(100.0) * jnp.sum(row_correct) / jnp.float32(B)
    return {"loss": loss, "ssl_loss": loss, "ssl_acc": acc}


# ------------------------------ reference / test ------------------------------


def _reference(z_i, z_j, temperature):
    """Pure-JAX f32 reference mirroring the PyTorch module (world_size == 1)."""
    tau = temperature
    qa = z_i.astype(jnp.float32)
    qb = z_j.astype(jnp.float32)
    qa = qa / jnp.maximum(jnp.linalg.norm(qa, axis=-1, keepdims=True), 1e-12)
    qb = qb / jnp.maximum(jnp.linalg.norm(qb, axis=-1, keepdims=True), 1e-12)
    b = qa.shape[0]
    masks = jnp.eye(b, dtype=jnp.float32) * 1e9
    l_aa = qa @ qa.T / tau - masks
    l_bb = qb @ qb.T / tau - masks
    l_ab = qa @ qb.T / tau
    l_ba = qb @ qa.T / tau
    labels = jnp.arange(b)
    logits_a = jnp.concatenate([l_ab, l_aa], axis=1)
    logits_b = jnp.concatenate([l_ba, l_bb], axis=1)

    def ce(logits):
        lse = jax.scipy.special.logsumexp(logits, axis=-1)
        return jnp.mean(lse - logits[jnp.arange(b), labels])

    loss = (ce(logits_a) + ce(logits_b)) / 2
    pred = jnp.argmax(logits_a, axis=-1)
    acc = 100.0 * jnp.mean((pred == labels).astype(jnp.float32))
    return loss, acc


if __name__ == "__main__":
    key = jax.random.PRNGKey(0)

    # Small smoke test (resident single-chunk key panel).
    B, D = 8, 32
    k1, k2 = jax.random.split(key)
    z_i = jax.random.normal(k1, (B, D), dtype=jnp.float32)
    z_j = jax.random.normal(k2, (B, D), dtype=jnp.float32)
    dist_labels = jnp.arange(B, dtype=jnp.int32)   # rank 0, world_size 1
    out = simclr_loss(z_i, z_j, dist_labels, temperature=0.1)
    jax.block_until_ready(out["loss"])
    jax.block_until_ready(out["ssl_acc"])
    ref_loss, _ = _reference(z_i, z_j, 0.1)
    assert abs(float(out["loss"]) - float(ref_loss)) < 0.15, (
        float(out["loss"]), float(ref_loss))

    # Exercise the chunked (online log-sum-exp) key path + bf16 inputs.
    B2, D2 = 64, 32
    k3, k4 = jax.random.split(k1)
    z_i2 = jax.random.normal(k3, (B2, D2), dtype=jnp.bfloat16)
    z_j2 = jax.random.normal(k4, (B2, D2), dtype=jnp.bfloat16)
    out2 = simclr_loss(z_i2, z_j2, jnp.arange(B2, dtype=jnp.int32),
                       temperature=0.1, max_key_chunk=64)
    jax.block_until_ready(out2["loss"])
    ref_loss2, _ = _reference(z_i2, z_j2, 0.1)
    assert abs(float(out2["loss"]) - float(ref_loss2)) < 0.15, (
        float(out2["loss"]), float(ref_loss2))

    print("KERNEL_OK")
</pallas_src>

<mosaic_0001>
module attributes {stable_mosaic.version = 11 : i64} {
  func.func @_normalize_kernel(%arg0: i32, %arg1: memref<8x32xf32, #tpu.memory_space<vmem>>, %arg2: memref<8x32xf32, #tpu.memory_space<vmem>>, %arg3: memref<2x8x32xbf16, #tpu.memory_space<vmem>>) attributes {dimension_semantics = [#tpu.dimension_semantics<parallel>], iteration_bounds = array<i64: 1>, scalar_prefetch = 0 : i64, scratch_operands = 0 : i64, tpu.core_type = #tpu.core_type<tc>, window_params = [{transform_indices = @transform_0, window_bounds = array<i64: 8, 32>}, {transform_indices = @transform_1, window_bounds = array<i64: 8, 32>}, {transform_indices = @transform_2, window_bounds = array<i64: 2, 8, 32>}]} {
    %c0 = arith.constant 0 : index
    %c0_0 = arith.constant 0 : index
    %0 = vector.load %arg1[%c0, %c0_0] : memref<8x32xf32, #tpu.memory_space<vmem>>, vector<8x32xf32>
    %1 = arith.mulf %0, %0 : vector<8x32xf32>
    %cst = arith.constant dense<0.000000e+00> : vector<8xf32>
    %2 = vector.multi_reduction <add>, %1, %cst [1] : vector<8x32xf32> to vector<8xf32>
    %3 = vector.shape_cast %2 : vector<8xf32> to vector<8x1xf32>
    %cst_1 = arith.constant 1.000000e-24 : f32
    %4 = vector.broadcast %cst_1 : f32 to vector<8x1xf32>
    %5 = arith.maximumf %3, %4 : vector<8x1xf32>
    %6 = math.rsqrt %5 : vector<8x1xf32>
    %7 = vector.broadcast %6 : vector<8x1xf32> to vector<8x32xf32>
    %8 = arith.mulf %0, %7 : vector<8x32xf32>
    %9 = arith.truncf %8 : vector<8x32xf32> to vector<8x32xbf16>
    %c0_2 = arith.constant 0 : index
    %c0_3 = arith.constant 0 : index
    %c0_4 = arith.constant 0 : index
    %10 = vector.load %arg3[%c0_2, %c0_3, %c0_4] : memref<2x8x32xbf16, #tpu.memory_space<vmem>>, vector<1x8x32xbf16>
    %11 = vector.shape_cast %10 : vector<1x8x32xbf16> to vector<8x32xbf16>
    %12 = vector.shape_cast %9 : vector<8x32xbf16> to vector<1x8x32xbf16>
    tpu.vector_store %arg3[%c0_2, %c0_3, %c0_4], %12 {strides = array<i32>} : memref<2x8x32xbf16, #tpu.memory_space<vmem>>, vector<1x8x32xbf16>,
    %c0_5 = arith.constant 0 : index
    %c0_6 = arith.constant 0 : index
    %13 = vector.load %arg2[%c0_5, %c0_6] : memref<8x32xf32, #tpu.memory_space<vmem>>, vector<8x32xf32>
    %14 = arith.mulf %13, %13 : vector<8x32xf32>
    %cst_7 = arith.constant dense<0.000000e+00> : vector<8xf32>
    %15 = vector.multi_reduction <add>, %14, %cst_7 [1] : vector<8x32xf32> to vector<8xf32>
    %16 = vector.shape_cast %15 : vector<8xf32> to vector<8x1xf32>
    %cst_8 = arith.constant 1.000000e-24 : f32
    %17 = vector.broadcast %cst_8 : f32 to vector<8x1xf32>
    %18 = arith.maximumf %16, %17 : vector<8x1xf32>
    %19 = math.rsqrt %18 : vector<8x1xf32>
    %20 = vector.broadcast %19 : vector<8x1xf32> to vector<8x32xf32>
    %21 = arith.mulf %13, %20 : vector<8x32xf32>
    %22 = arith.truncf %21 : vector<8x32xf32> to vector<8x32xbf16>
    %c1 = arith.constant 1 : index
    %c0_9 = arith.constant 0 : index
    %c0_10 = arith.constant 0 : index
    %23 = vector.load %arg3[%c1, %c0_9, %c0_10] : memref<2x8x32xbf16, #tpu.memory_space<vmem>>, vector<1x8x32xbf16>
    %24 = vector.shape_cast %23 : vector<1x8x32xbf16> to vector<8x32xbf16>
    %25 = vector.shape_cast %22 : vector<8x32xbf16> to vector<1x8x32xbf16>
    tpu.vector_store %arg3[%c1, %c0_9, %c0_10], %25 {strides = array<i32>} : memref<2x8x32xbf16, #tpu.memory_space<vmem>>, vector<1x8x32xbf16>,
    return
  }
  func.func @transform_0(%arg0: i32) -> (i32, i32) {
    %c0_i32 = arith.constant 0 : i32
    %c0_i32_0 = arith.constant 0 : i32
    return %arg0, %c0_i32 : i32, i32
  }
  func.func @transform_1(%arg0: i32) -> (i32, i32) {
    %c0_i32 = arith.constant 0 : i32
    %c0_i32_0 = arith.constant 0 : i32
    return %arg0, %c0_i32 : i32, i32
  }
  func.func @transform_2(%arg0: i32) -> (i32, i32, i32) {
    %c0_i32 = arith.constant 0 : i32
    %c0_i32_0 = arith.constant 0 : i32
    %c0_i32_1 = arith.constant 0 : i32
    return %c0_i32, %arg0, %c0_i32_0 : i32, i32, i32
  }
}

</mosaic_0001>

<bundles_post_ra>
// kernel: tpu_custom_call.1
= control target key start
LH: loop header
LB: loop body
LE: loop exit
PB: predicated region body
PF: predicated region fallthrough
CT: control target
= control target key end

     0   :  { %7 = vsyncpa [#allocation3], 0  ;;  %s214_s0 = inlined_call_operand.hbm [shape: f32[8,32], index: 0, kind: input, shape index: {}]   ;;  %s215_s1 = inlined_call_operand.hbm [shape: f32[8,32], index: 1, kind: input, shape index: {}]   ;;  %s216_s2 = inlined_call_operand.hbm [shape: bf16[2,8,32], index: 2, kind: output, shape index: {}]  }
   0x1   :  { %8 = vsyncpa [#allocation6], 0 }
   0x2   :  { %9 = vsyncpa [#allocation4], 0  ;;  %s158_s9 = smov [#allocation2]   ;;  %s159_s11 = smov [#allocation5]  }
   0x3   :  { %s16_s10 = sshll.u32 %s158_s9, 4  ;;  %s26_s12 = sshll.u32 %s159_s11, 4  ;;  %s17_s10 = int_to_ptr.vmem [resolvable:$true] %s16_s10  ;;  %s27_s12 = int_to_ptr.vmem [resolvable:$true] %s26_s12 }
   0x4   :  { %s86_s15 = scalar_lea.hbm %s214_s0, 128 }
   0x5   :  { %p87_p0 = scmp.ne.s32.totalorder %s214_s0, %s86_s15  ;;  %p90_p1 = scmp.lt.u32.totalorder %s86_s15, %s214_s0 }
   0x7   :  { %p92_p2 = pnand %p90_p1, %p87_p0 }
   0x9   :  { %95 = shalt.err (!%p92_p2)
}
   0xa   :  { %s96_s20 = scalar_lea.vmem %s17_s10, 128  ;;  %p101_p4 = scmp.lt.s32.totalorder %s17_s10, %s17_s10 }
   0xb   :  { %p97_p3 = scmp.ne.s32.totalorder %s17_s10, %s96_s20  ;;  %p102_p5 = scmp.lt.s32.totalorder %s96_s20, %s96_s20 }
   0xd   :  { %p103_p6 = por %p102_p5, %p101_p4 }
   0xf   :  { %p104_p7 = pnand %p103_p6, %p97_p3 }
  0x11   :  { %107 = shalt.err (!%p104_p7)
}
  0x12   :  { %19 = dma.hbm_to_vmem [thread:$0]  %s214_s0, 128, %s17_s10, [#allocation3]  }
  0x13   :  { %s108_s25 = scalar_lea.hbm %s215_s1, 128 }
  0x14   :  { %p109_p8 = scmp.ne.s32.totalorder %s215_s1, %s108_s25  ;;  %p112_p9 = scmp.lt.u32.totalorder %s108_s25, %s215_s1 }
  0x16   :  { %p114_p10 = pnand %p112_p9, %p109_p8 }
  0x18   :  { %117 = shalt.err (!%p114_p10)
}
  0x19   :  { %s118_s30 = scalar_lea.vmem %s27_s12, 128  ;;  %p123_p12 = scmp.lt.s32.totalorder %s27_s12, %s27_s12 }
  0x1a   :  { %p119_p11 = scmp.ne.s32.totalorder %s27_s12, %s118_s30  ;;  %p124_p13 = scmp.lt.s32.totalorder %s118_s30, %s118_s30 }
  0x1c   :  { %p125_p0 = por %p124_p13, %p123_p12 }
  0x1e   :  { %p126_p1 = pnand %p125_p0, %p119_p11 }
  0x20   :  { %129 = shalt.err (!%p126_p1)
}
  0x21   :  { %29 = dma.hbm_to_vmem [thread:$0]  %s215_s1, 128, %s27_s12, [#allocation6]  }
  0x22   :  { %152 = dma.done.wait [#allocation3], 128  }
  0x23   :  { %153 = vsyncadd [#allocation3], 4294967168 }
  0x24   :  { %154 = dma.done.wait [#allocation6], 128  }
  0x25   :  { %155 = vsyncadd [#allocation6], 4294967168  ;;  %v36_v0 = vld [vmem:[#allocation2] sm:$0xff]  ;;  %vm38_vm0 = vcmask 261120   ;;  %v48_v1 = vld [vmem:[#allocation5] sm:$0xff]  ;;  %vm46_vm1 = vcmask 257024  }
  0x26   :  { %v37_v2 = vmul.f32 %v36_v0, %v36_v0  ;;  %v49_v3 = vmul.f32 %v48_v1, %v48_v1  ;;  %s160_s1 = smov [#allocation7]  }
  0x27   :  { %s64_s4 = sshll.u32 %s160_s1, 4  ;;  %s65_s4 = int_to_ptr.vmem [resolvable:$true] %s64_s4 }
  0x28   :  { %v39_v4 = vsel %vm38_vm0, %v37_v2, 0.0  ;;  %v50_v5 = vsel %vm38_vm0, %v49_v3, 0.0  ;;  %s130_s5 = scalar_lea.vmem %s65_s4, 128  ;;  %p135_p3 = scmp.lt.s32.totalorder %s65_s4, %s65_s4 }
  0x29   :  { %40 = vadd.xlane.f32.xlu0 %v39_v4  ;;  %p131_p2 = scmp.ne.s32.totalorder %s65_s4, %s130_s5  ;;  %p136_p4 = scmp.lt.s32.totalorder %s130_s5, %s130_s5 }
  0x2b   :  { %p137_p5 = por %p136_p4, %p135_p3 }
  0x2d   :  { %51 = vadd.xlane.f32.xlu0 %v50_v5  ;;  %p138_p6 = pnand %p137_p5, %p131_p2 }
  0xb6   :  { %v41_v6 = vpop.xlane.xlu0 %40 }
  0xb7   :  { %v42_v7 = vmax.f32 %v41_v6, 1e-24 }
  0xb9   :  { %82 = vrsqrt.f32 %v42_v7 }
  0xba   :  { %v52_v8 = vpop.xlane.xlu0 %51 }
  0xbb   :  { %v53_v9 = vmax.f32 %v52_v8, 1e-24 }
  0xbd   :  { %84 = vrsqrt.f32 %v53_v9 }
  0xc3   :  { %v83_v10 = vpop.eup %82 }
  0xc4   :  { %v44_v11 = vmul.f32 %v83_v10, %v36_v0 }
  0xc6   :  { %v45_v12 = vpack.c.bf16 %v44_v11, %v44_v11 }
  0xc7   :  { %v85_v13 = vpop.eup %84 }
  0xc8   :  { %v55_v14 = vmul.f32 %v85_v13, %v48_v1  ;;  %47 = vst.msk [vmem:[#allocation7] sm:$0xf] %vm46_vm1, %v45_v12 }
  0xca   :  { %v56_v15 = vpack.c.bf16 %v55_v14, %v55_v14 }
  0xcc   :  { %58 = vst.msk [vmem:[#allocation7 + $0x4] sm:$0xf] %vm46_vm1, %v56_v15 }
  0xcd   :  { %141 = shalt.err (!%p138_p6)
}
  0xce   :  { %s142_s8 = scalar_lea.hbm %s216_s2, 128 }
  0xcf   :  { %p143_p7 = scmp.ne.s32.totalorder %s216_s2, %s142_s8  ;;  %p146_p8 = scmp.lt.u32.totalorder %s142_s8, %s216_s2 }
  0xd1   :  { %p148_p9 = pnand %p146_p8, %p143_p7 }
  0xd3   :  { %151 = shalt.err (!%p148_p9)
}
  0xd4   :  { %s161_s13 = smov 64   ;;  %s162_s14 = smov 4  }
  0xd5   :  { %70 = dma.vmem_to_hbm [thread:$0]  %s65_s4, 128, %s216_s2, [#allocation4], %s161_s13, %s161_s13, %s162_s14  }
  0xd6   :  { %156 = dma.done.wait [#allocation4], 128  }
  0xd7   :  { %157 = vsyncadd [#allocation4], 4294967168 }
  0xd8   :  { %74 = vsyncpa [#allocation3], 1 }
  0xd9   :  { %75 = vsyncpa [#allocation6], 1 }
  0xda   :  { %76 = vsyncpa [#allocation4], 1 }

</bundles_post_ra>
